<compile_context>
chip_gen: v7x
topology: tpu7x:2x2x1
jax: 0.10.0
libtpu: 0.0.40
codegen_flags: <defaults>
</compile_context>

<pallas_src>
import functools

import jax
import jax.numpy as jnp
from jax import lax
from jax.experimental import pallas as pl
from jax.experimental.pallas import tpu as pltpu


def _round_up(x: int, m: int) -> int:
    return (x + m - 1) // m * m


def _vmem_budget_bytes() -> int:
    """Generation-aware VMEM budget: ~75% of physical (≈48 MiB v7x, ≈96 MiB v5e/v6e)."""
    cap = 64 << 20
    try:
        info_fn = getattr(pltpu, "get_tpu_info", None)
        if info_fn is not None:
            cap = int(info_fn().vmem_capacity_bytes)
    except Exception:
        cap = 64 << 20
    return max(8 << 20, (cap * 3) // 4)


# ----------------------------------------------------------------------------
# Path 1: small table, VMEM resident -> one-hot @ emb on the MXU.
# ----------------------------------------------------------------------------
def _vmem_gather_kernel(ids_ref, emb_ref, out_ref):
    # ids_ref: (block, 1) int32, emb_ref: (num_nodes, embed_dim), both in VMEM.
    block = ids_ref.shape[0]
    num_nodes = emb_ref.shape[0]
    node_iota = lax.broadcasted_iota(jnp.int32, (block, num_nodes), 1)
    onehot = (ids_ref[...] == node_iota).astype(jnp.float32)          # (block, n)
    out_ref[...] = jnp.dot(onehot, emb_ref[...].astype(jnp.float32),
                           preferred_element_type=jnp.float32)


def _gather_vmem(emb, ids_padded, num_blocks, block, embed_dim):
    num_nodes = emb.shape[0]
    ids2d = ids_padded.reshape(num_blocks * block, 1)

    grid_spec = pltpu.PrefetchScalarGridSpec(
        num_scalar_prefetch=0,
        grid=(num_blocks,),
        in_specs=[
            pl.BlockSpec((block, 1), lambda i: (i, 0)),
            pl.BlockSpec((num_nodes, embed_dim), lambda i: (0, 0)),  # table resident
        ],
        out_specs=pl.BlockSpec((block, embed_dim), lambda i: (i, 0)),
    )

    vmem_need = (2 * num_nodes * embed_dim * emb.dtype.itemsize      # table (2-buffered)
                 + block * num_nodes * 4                              # one-hot intermediate
                 + 2 * block * embed_dim * 4                          # f32 output blocks
                 + 2 * block * 4
                 + (2 << 20))
    vmem_limit = int(min(max(vmem_need, 8 << 20), _vmem_budget_bytes()))

    return pl.pallas_call(
        _vmem_gather_kernel,
        grid_spec=grid_spec,
        out_shape=jax.ShapeDtypeStruct((num_blocks * block, embed_dim), jnp.float32),
        compiler_params=pltpu.CompilerParams(
            dimension_semantics=("parallel",),  # id blocks are independent here
            vmem_limit_bytes=vmem_limit,
        ),
    )(ids2d, emb)


# ----------------------------------------------------------------------------
# Path 2: large table in HBM -> per-row DMAs, double-buffered across blocks.
# ----------------------------------------------------------------------------
def _hbm_gather_kernel(block_ids, ids_ref, emb_hbm, out_ref, buf_ref, sem):
    i = pl.program_id(0)
    num_blocks = pl.num_programs(0)

    def issue_block(block_idx, slot):
        base = block_idx * block_ids

        def issue_row(r, carry):
            row = ids_ref[base + r]
            pltpu.make_async_copy(
                emb_hbm.at[pl.ds(row, 1), :],
                buf_ref.at[slot, pl.ds(r, 1), :],
                sem.at[slot],
            ).start()
            return carry

        # Unrolled issue loop: descriptor issue is the scalar-path bottleneck.
        lax.fori_loop(0, block_ids, issue_row, None, unroll=8)

    # Prime the pipeline with block 0 on the very first step.
    @pl.when(i == 0)
    def _prime():
        issue_block(0, 0)

    # Prefetch next block's rows into the other slot BEFORE waiting (P4).
    @pl.when(i + 1 < num_blocks)
    def _prefetch_next():
        issue_block(i + 1, (i + 1) % 2)

    slot = i % 2
    # Single aggregate wait for the whole block: all row DMAs of this slot
    # target the same semaphore and DMA semaphores account bytes, so one
    # descriptor covering (block_ids, embed_dim) retires them all.
    pltpu.make_async_copy(buf_ref.at[slot], buf_ref.at[slot], sem.at[slot]).wait()

    # Dense (block_ids, embed_dim) f32 tile store -> unmasked vector stores +
    # one large output writeback DMA (pipelined by Pallas).
    out_ref[...] = buf_ref[slot].astype(out_ref.dtype)


def _gather_hbm(emb, ids_padded, num_blocks, block_ids, embed_dim):
    padded = ids_padded.shape[0]
    kernel = functools.partial(_hbm_gather_kernel, block_ids)

    grid_spec = pltpu.PrefetchScalarGridSpec(
        num_scalar_prefetch=1,  # ids -> SMEM, readable scalar-by-scalar in-kernel
        grid=(num_blocks,),
        in_specs=[pl.BlockSpec(memory_space=pl.ANY)],  # table stays in HBM
        out_specs=pl.BlockSpec((block_ids, embed_dim), lambda i, ids_ref: (i, 0)),
        scratch_shapes=[
            pltpu.VMEM((2, block_ids, embed_dim), emb.dtype),  # double-buffered staging
            pltpu.SemaphoreType.DMA((2,)),                     # one DMA sem per slot
        ],
    )

    vmem_need = (2 * block_ids * embed_dim * emb.dtype.itemsize  # staging x2
                 + 2 * block_ids * embed_dim * 4                 # f32 out blocks x2
                 + (2 << 20))
    vmem_limit = int(min(max(vmem_need, 8 << 20), _vmem_budget_bytes()))

    return pl.pallas_call(
        kernel,
        grid_spec=grid_spec,
        out_shape=jax.ShapeDtypeStruct((padded, embed_dim), jnp.float32),
        compiler_params=pltpu.CompilerParams(
            # Step i prefetches step i+1 into shared scratch -> must run sequentially.
            dimension_semantics=("arbitrary",),
            vmem_limit_bytes=vmem_limit,
        ),
    )(ids_padded, emb)


# ----------------------------------------------------------------------------
# Public wrapper (== GatherFn.forward)
# ----------------------------------------------------------------------------
def wholememory_gather(emb: jax.Array, ids: jax.Array, *,
                       block_ids: int = 1024,
                       use_vmem_fast_path: bool | None = None) -> jax.Array:
    """out[i, :] = float32(emb[ids[i], :])."""
    num_nodes, embed_dim = emb.shape
    num_ids = int(ids.shape[0])
    if num_ids == 0:
        return jnp.zeros((0, embed_dim), jnp.float32)

    ids = ids.astype(jnp.int32)

    table_bytes = num_nodes * embed_dim * emb.dtype.itemsize
    if use_vmem_fast_path is None:
        use_vmem_fast_path = (num_nodes <= 2048) and (table_bytes <= (4 << 20))

    if use_vmem_fast_path:
        block = max(8, min(256, _round_up(num_ids, 8)))
        padded = _round_up(num_ids, block)
        ids_padded = jnp.zeros((padded,), jnp.int32).at[:num_ids].set(ids)
        out = _gather_vmem(emb, ids_padded, padded // block, block, embed_dim)
    else:
        # Size the block so 2x staging + 2x f32 output blocks fit the VMEM budget.
        per_id_bytes = embed_dim * (2 * emb.dtype.itemsize + 2 * 4)
        budget = max(4 << 20, _vmem_budget_bytes() - (4 << 20))
        max_block = max(8, (budget // per_id_bytes) // 8 * 8)
        block = max(8, min(block_ids, max_block, _round_up(num_ids, 8)))
        block = (block // 8) * 8
        padded = _round_up(num_ids, block)
        # Padded tail ids gather row 0 (valid); padded rows are sliced off below.
        ids_padded = jnp.zeros((padded,), jnp.int32).at[:num_ids].set(ids)
        out = _gather_hbm(emb, ids_padded, padded // block, block, embed_dim)

    return out[:num_ids]


if __name__ == "__main__":
    key = jax.random.PRNGKey(0)
    k1, k2, k3, k4, k5, k6 = jax.random.split(key, 6)

    # --- Test A: small f32 table -> VMEM-resident one-hot/MXU fast path ---
    emb_a = jax.random.normal(k1, (512, 128), dtype=jnp.float32)
    ids_a = jax.random.randint(k2, (300,), 0, 512, dtype=jnp.int32)
    out_a = jax.block_until_ready(wholememory_gather(emb_a, ids_a))
    ref_a = emb_a[ids_a].astype(jnp.float32)
    assert out_a.shape == (300, 128) and out_a.dtype == jnp.float32
    assert jnp.allclose(out_a, ref_a), "fast-path mismatch vs reference"

    # --- Test B: forced HBM path (per-row DMAs, double-buffered, ragged tail) ---
    emb_b = jax.random.normal(k3, (2048, 128), dtype=jnp.float32)
    ids_b = jax.random.randint(k4, (1037,), 0, 2048, dtype=jnp.int32)
    out_b = jax.block_until_ready(
        wholememory_gather(emb_b, ids_b, block_ids=256, use_vmem_fast_path=False))
    ref_b = emb_b[ids_b].astype(jnp.float32)
    assert out_b.shape == (1037, 128) and out_b.dtype == jnp.float32
    assert jnp.allclose(out_b, ref_b), "hbm-path mismatch vs reference"

    # --- Test C: bf16 table -> fast path exercising the float32 cast ---
    emb_c = jax.random.normal(k5, (640, 256), dtype=jnp.float32).astype(jnp.bfloat16)
    ids_c = jax.random.randint(k6, (200,), 0, 640, dtype=jnp.int32)
    out_c = jax.block_until_ready(wholememory_gather(emb_c, ids_c))
    ref_c = emb_c[ids_c].astype(jnp.float32)
    assert out_c.shape == (200, 256) and out_c.dtype == jnp.float32
    assert jnp.allclose(out_c, ref_c), "bf16 cast path mismatch vs reference"

    print("KERNEL_OK")
</pallas_src>

<mosaic_0001>
module attributes {stable_mosaic.version = 11 : i64} {
  func.func @_vmem_gather_kernel(%arg0: i32, %arg1: memref<256x1xi32, #tpu.memory_space<vmem>>, %arg2: memref<512x128xf32, #tpu.memory_space<vmem>>, %arg3: memref<256x128xf32, #tpu.memory_space<vmem>>) attributes {dimension_semantics = [#tpu.dimension_semantics<parallel>], iteration_bounds = array<i64: 2>, scalar_prefetch = 0 : i64, scratch_operands = 0 : i64, tpu.core_type = #tpu.core_type<tc>, window_params = [{transform_indices = @transform_0, window_bounds = array<i64: 256, 1>}, {pipeline_mode = #tpu.pipeline_mode<synchronous>, transform_indices = @transform_1, window_bounds = array<i64: 512, 128>}, {transform_indices = @transform_2, window_bounds = array<i64: 256, 128>}]} {
    %0 = tpu.iota {dimensions = array<i32: 1>} : vector<256x512xi32>
    %c0 = arith.constant 0 : index
    %c0_0 = arith.constant 0 : index
    %1 = vector.load %arg1[%c0, %c0_0] : memref<256x1xi32, #tpu.memory_space<vmem>>, vector<256x1xi32>
    %2 = vector.broadcast %1 : vector<256x1xi32> to vector<256x512xi32>
    %3 = arith.cmpi eq, %2, %0 : vector<256x512xi32>
    %4 = arith.extui %3 : vector<256x512xi1> to vector<256x512xi32>
    %5 = arith.sitofp %4 : vector<256x512xi32> to vector<256x512xf32>
    %c0_1 = arith.constant 0 : index
    %c0_2 = arith.constant 0 : index
    %6 = vector.load %arg2[%c0_1, %c0_2] : memref<512x128xf32, #tpu.memory_space<vmem>>, vector<512x128xf32>
    %cst = arith.constant dense<0.000000e+00> : vector<256x128xf32>
    %7 = tpu.matmul %5, %6, %cst {dimension_numbers = #tpu.dot_dimension_numbers<[1], [0], [0], [1], [0, 0, 1, 1], [], []>} : vector<256x512xf32>, vector<512x128xf32>, vector<256x128xf32> -> vector<256x128xf32>
    %c0_3 = arith.constant 0 : index
    %c0_4 = arith.constant 0 : index
    %8 = vector.load %arg3[%c0_3, %c0_4] : memref<256x128xf32, #tpu.memory_space<vmem>>, vector<256x128xf32>
    tpu.vector_store %arg3[%c0_3, %c0_4], %7 {strides = array<i32>} : memref<256x128xf32, #tpu.memory_space<vmem>>, vector<256x128xf32>,
    return
  }
  func.func @transform_0(%arg0: i32) -> (i32, i32) {
    %c0_i32 = arith.constant 0 : i32
    %c0_i32_0 = arith.constant 0 : i32
    return %arg0, %c0_i32 : i32, i32
  }
  func.func @transform_1(%arg0: i32) -> (i32, i32) {
    %c0_i32 = arith.constant 0 : i32
    %c0_i32_0 = arith.constant 0 : i32
    %c0_i32_1 = arith.constant 0 : i32
    return %c0_i32, %c0_i32_0 : i32, i32
  }
  func.func @transform_2(%arg0: i32) -> (i32, i32) {
    %c0_i32 = arith.constant 0 : i32
    %c0_i32_0 = arith.constant 0 : i32
    return %arg0, %c0_i32 : i32, i32
  }
}

</mosaic_0001>

<bundles_post_ra>
// kernel: tpu_custom_call.1
= control target key start
LH: loop header
LB: loop body
LE: loop exit
PB: predicated region body
PF: predicated region fallthrough
CT: control target
= control target key end

     0   :  { %7 = vsyncpa [#allocation3], 0  ;;  %s2478_s0 = inlined_call_operand.vmem [shape: s32[512,1], index: 0, kind: input, shape index: {}]   ;;  %s2479_s1 = inlined_call_operand.vmem [shape: f32[512,128], index: 1, kind: input, shape index: {}]   ;;  %s2480_s2 = inlined_call_operand.hbm [shape: f32[512,128], index: 2, kind: output, shape index: {}]  }
   0x1   :  { %9 = vsyncpa [#allocation3 + $0x1], 0  ;;  %s1812_s9 = smov 0   ;;  %s1814_s10 = smov 0  }
   0x2   :  { %s1816_s11 = smov 0   ;;  %s1818_s12 = smov 0  }
   0x3 LB: > { %s1833_s13 = sadd.s32 4294967295, %s1789_s12   ;;  %s1284_s14 = sadd.s32 4294967294, %s1789_s12   ;;  %s1789_s12 = sphi %s1818_s12, %s2486_s12   ;;  %s1785_s11 = sphi %s1816_s11, %s2485_s11   ;;  %s1781_s10 = sphi %s1814_s10, %s2484_s10   ;;  %s1777_s9 = sphi %s1812_s9, %s2483_s9  }
   0x4   : > { %s1837_s15 = sadd.s32 1, %s1789_s12   ;;  %s69_s16 = sadd.s32 1, %s1785_s11 }
   0x5   : > { %s66_s17 = ssub.s32 %s1789_s12, %s1837_s15  ;;  %p79_p0 = scmp.ne.s32.totalorder %s1785_s11, %s1781_s10 }
   0x6   : > { %p67_p1 = scmp.eq.s32.totalorder %s66_s17, 0  ;;  %p80_p2 = scmp.eq.s32.totalorder %s1833_s13, 1 }
   0x7   : > { %p85_p3 = scmp.ne.s32.totalorder %s1781_s10, %s1777_s9  ;;  %p86_p4 = scmp.eq.s32.totalorder %s1284_s14, 1 }
   0x8   : > { %s1848_s18 = scalar_select %p67_p1, %s1785_s11, %s69_s16  }
   0x9   : > { %p1850_p5 = por %p80_p2, %p79_p0  ;;  %p1854_p6 = por %p86_p4, %p85_p3 }
   0xa   : > { %p1287_p7 = scmp.ge.s32.totalorder %s1789_s12, 1  ;;  %p116_p8 = scmp.lt.s32.totalorder %s1789_s12, 3 }
   0xc   : > { %p117_p9 = pnand %p1287_p7, %p116_p8 }
   0xd   : > { %s1289_s21 = sshll.u32 (!%p117_p9), %s1833_s13, 5  ;;  %v662_v0 = vld [vmem:[%s2479_s1] sm:$0xff] (!%p117_p9)  ;;  %v663_v1 = vld [vmem:[%s2479_s1 + $0x8] sm:$0xff] (!%p117_p9)  ;;  %v1791_v3 = vmov (!%p117_p9), 0   ;;  %v664_v6 = vld [vmem:[%s2479_s1 + $0x10] sm:$0xff] (!%p117_p9)  ;;  %v1792_v8 = vmov (!%p117_p9), 0.0|0.0  }
   0xe   : > { %120 = sbr.rel (%p117_p9) target bundleno = 508 (0x1fc), region = 28  ;;  %v694_v2 = vld [vmem:[%s2479_s1 + $0x100] sm:$0xff] (!%p117_p9)  ;;  %1726 = vset.pattern.permute.xlu1 (!%p117_p9), %v1791_v3  ;;  %1725 = vset.pattern.permute.xlu0 (!%p117_p9), %v1791_v3  ;;  %p139_p10 = scmp.lt.s32.totalorder (!%p117_p9), %s1289_s21, 63  ;;  %v1554_v4 = vpack.c.bf16 (!%p117_p9), %v663_v1, %v662_v0  ;;  %v695_v5 = vld [vmem:[%s2479_s1 + $0x108] sm:$0xff] (!%p117_p9)  ;;  %v665_v7 = vld [vmem:[%s2479_s1 + $0x18] sm:$0xff] (!%p117_p9) }
   0xf   : > { %1553 = vmatprep.subr.bf16.mxu1 (!%p117_p9), %v1792_v8  ;;  %1601 = vmatprep.subr.bf16.mxu0 (!%p117_p9), %v1792_v8  ;;  %v1602_v9 = vpack.c.bf16 (!%p117_p9), %v695_v5, %v694_v2  ;;  %v696_v10 = vld [vmem:[%s2479_s1 + $0x110] sm:$0xff] (!%p117_p9)  ;;  %v697_v11 = vld [vmem:[%s2479_s1 + $0x118] sm:$0xff] (!%p117_p9)  ;;  %v1557_v12 = vpack.c.bf16 (!%p117_p9), %v665_v7, %v664_v6  ;;  %v666_v13 = vld [vmem:[%s2479_s1 + $0x20] sm:$0xff] (!%p117_p9)  ;;  %s1552_s30 = sshll.u32 (!%p117_p9), %s1833_s13, 12  ;;  %s1794_s7 = smov (!%p117_p9), [#allocation2]  }
  0x10   : > { %1555 = vmatpush1.bf16.msra.mxu1 (!%p117_p9), %v1554_v4  ;;  %v667_v14 = vld [vmem:[%s2479_s1 + $0x28] sm:$0xff] (!%p117_p9)  ;;  %v1605_v15 = vpack.c.bf16 (!%p117_p9), %v697_v11, %v696_v10  ;;  %v698_v16 = vld [vmem:[%s2479_s1 + $0x120] sm:$0xff] (!%p117_p9)  ;;  %v668_v21 = vld [vmem:[%s2479_s1 + $0x30] sm:$0xff] (!%p117_p9)  ;;  %s2430_s5 = scalar_lea.hbm (!%p117_p9), %s2480_s2, %s1552_s30  ;;  %s1731_s8 = sshll.u32 (!%p117_p9), %s1794_s7, 4  ;;  %s1732_s8 = int_to_ptr.vmem [resolvable:$false] %s1731_s8 }
  0x11   : > { %1603 = vmatpush1.bf16.msra.mxu0 (!%p117_p9), %v1602_v9  ;;  %1556 = vmatprep.subr.bf16.mxu1 (!%p117_p9), %v1792_v8  ;;  %v699_v17 = vld [vmem:[%s2479_s1 + $0x128] sm:$0xff] (!%p117_p9)  ;;  %v1560_v20 = vpack.c.bf16 (!%p117_p9), %v667_v14, %v666_v13  ;;  %v669_v22 = vld [vmem:[%s2479_s1 + $0x38] sm:$0xff] (!%p117_p9)  ;;  %v700_v26 = vld [vmem:[%s2479_s1 + $0x130] sm:$0xff] (!%p117_p9)  ;;  %s1733_s14 = scalar_lea.vmem (!%p117_p9), %s1732_s8, 8192 }
  0x12   : > { %1604 = vmatprep.subr.bf16.mxu0 (!%p117_p9), %v1792_v8  ;;  %v1608_v25 = vpack.c.bf16 (!%p117_p9), %v699_v17, %v698_v16  ;;  %v701_v27 = vld [vmem:[%s2479_s1 + $0x138] sm:$0xff] (!%p117_p9)  ;;  %v1563_v28 = vpack.c.bf16 (!%p117_p9), %v669_v22, %v668_v21  ;;  %v670_v29 = vld [vmem:[%s2479_s1 + $0x40] sm:$0xff] (!%p117_p9)  ;;  %v671_v30 = vld [vmem:[%s2479_s1 + $0x48] sm:$0xff] (!%p117_p9) }
  0x13   : > { %v1611_v33 = vpack.c.bf16 (!%p117_p9), %v701_v27, %v700_v26  ;;  %v702_v34 = vld [vmem:[%s2479_s1 + $0x140] sm:$0xff] (!%p117_p9)  ;;  %v703_v35 = vld [vmem:[%s2479_s1 + $0x148] sm:$0xff] (!%p117_p9)  ;;  %v1566_v36 = vpack.c.bf16 (!%p117_p9), %v671_v30, %v670_v29  ;;  %v672_v37 = vld [vmem:[%s2479_s1 + $0x50] sm:$0xff] (!%p117_p9) }
  0x14   : > { %1558 = vmatpush1.bf16.msra.mxu1 (!%p117_p9), %v1557_v12  ;;  %v1614_v40 = vpack.c.bf16 (!%p117_p9), %v703_v35, %v702_v34  ;;  %v673_v41 = vld [vmem:[%s2479_s1 + $0x58] sm:$0xff] (!%p117_p9)  ;;  %v704_v42 = vld [vmem:[%s2479_s1 + $0x150] sm:$0xff] (!%p117_p9)  ;;  %v674_v45 = vld [vmem:[%s2479_s1 + $0x60] sm:$0xff] (!%p117_p9) }
  0x15   : > { %s2488_s21 = smov (!%p139_p10, %s1289_s21), 63  ;;  %1606 = vmatpush1.bf16.msra.mxu0 %v1605_v15  ;;  %1559 = vmatprep.subr.bf16.mxu1 %v1792_v8  ;;  %v705_v43 = vld [vmem:[%s2479_s1 + $0x158] sm:$0xff]  ;;  %v1569_v44 = vpack.c.bf16 %v673_v41, %v672_v37  ;;  %v675_v46 = vld [vmem:[%s2479_s1 + $0x68] sm:$0xff]  ;;  %v706_v50 = vld [vmem:[%s2479_s1 + $0x160] sm:$0xff] }
  0x16   : > { %s1290_s24 = sshll.u32 %s2488_s21, 3  ;;  %1607 = vmatprep.subr.bf16.mxu0 %v1792_v8  ;;  %v1617_v49 = vpack.c.bf16 %v705_v43, %v704_v42  ;;  %v707_v51 = vld [vmem:[%s2479_s1 + $0x168] sm:$0xff]  ;;  %v1572_v52 = vpack.c.bf16 %v675_v46, %v674_v45  ;;  %v676_v53 = vld [vmem:[%s2479_s1 + $0x70] sm:$0xff]  ;;  %v677_v54 = vld [vmem:[%s2479_s1 + $0x78] sm:$0xff] }
  0x17   : > { %s1898_s27 = scalar_lea.vmem %s2478_s0, %s1290_s24  ;;  %v1620_v57 = vpack.c.bf16 %v707_v51, %v706_v50  ;;  %v708_v58 = vld [vmem:[%s2479_s1 + $0x170] sm:$0xff]  ;;  %v709_v59 = vld [vmem:[%s2479_s1 + $0x178] sm:$0xff]  ;;  %v1575_v60 = vpack.c.bf16 %v677_v54, %v676_v53  ;;  %v678_v61 = vld [vmem:[%s2479_s1 + $0x80] sm:$0xff] }
  0x18   : > { %v152_v18 = vld [vmem:[%s1898_s27 + $0x10] sm:$0xff]  ;;  %v150_v19 = vld [vmem:[%s1898_s27] sm:$0xff]  ;;  %v153_v23 = vld [vmem:[%s1898_s27 + $0x18] sm:$0xff]  ;;  %1561 = vmatpush1.bf16.msra.mxu1 %v1560_v20  ;;  %v1623_v1 = vpack.c.bf16 %v709_v59, %v708_v58 }
  0x19   : > { %189 = vperm.xlu1 %1726, %v152_v18   ;;  %183 = vperm.xlu0 %1725, %v150_v19   ;;  %v151_v24 = vld [vmem:[%s1898_s27 + $0x8] sm:$0xff]  ;;  %v154_v32 = vld [vmem:[%s1898_s27 + $0x20] sm:$0xff]  ;;  %v157_v38 = vld [vmem:[%s1898_s27 + $0x38] sm:$0xff] }
  0x1a   : > { %v155_v31 = vld [vmem:[%s1898_s27 + $0x28] sm:$0xff]  ;;  %1609 = vmatpush1.bf16.msra.mxu0 %v1608_v25  ;;  %1562 = vmatprep.subr.bf16.mxu1 %v1792_v8  ;;  %v156_v39 = vld [vmem:[%s1898_s27 + $0x30] sm:$0xff]  ;;  %v158_v48 = vld [vmem:[%s1898_s27 + $0x40] sm:$0xff] }
  0x1b   : > { %1610 = vmatprep.subr.bf16.mxu0 %v1792_v8  ;;  %v159_v47 = vld [vmem:[%s1898_s27 + $0x48] sm:$0xff]  ;;  %v161_v55 = vld [vmem:[%s1898_s27 + $0x58] sm:$0xff]  ;;  %v160_v56 = vld [vmem:[%s1898_s27 + $0x50] sm:$0xff] }
  0x1c   : > { %1564 = vmatpush1.bf16.msra.mxu1 %v1563_v28  ;;  %v679_v62 = vld [vmem:[%s2479_s1 + $0x88] sm:$0xff]  ;;  %v162_v0 = vld [vmem:[%s1898_s27 + $0x60] sm:$0xff]  ;;  %v680_v5 = vld [vmem:[%s2479_s1 + $0x90] sm:$0xff] }
  0x1d   : > { %192 = vperm.xlu1 %1726, %v153_v23   ;;  %186 = vperm.xlu0 %1725, %v151_v24   ;;  %v163_v63 = vld [vmem:[%s1898_s27 + $0x68] sm:$0xff]  ;;  %v710_v2 = vld [vmem:[%s2479_s1 + $0x180] sm:$0xff]  ;;  %v1578_v4 = vpack.c.bf16 %v679_v62, %v678_v61  ;;  %v681_v6 = vld [vmem:[%s2479_s1 + $0x98] sm:$0xff] }
  0x1e   : > { %1612 = vmatpush1.bf16.msra.mxu0 %v1611_v33  ;;  %1565 = vmatprep.subr.bf16.mxu1 %v1792_v8  ;;  %v711_v3 = vld [vmem:[%s2479_s1 + $0x188] sm:$0xff]  ;;  %v165_v7 = vld [vmem:[%s1898_s27 + $0x78] sm:$0xff]  ;;  %v164_v9 = vld [vmem:[%s1898_s27 + $0x70] sm:$0xff]  ;;  %v1581_v13 = vpack.c.bf16 %v681_v6, %v680_v5 }
  0x1f   : > { %1613 = vmatprep.subr.bf16.mxu0 %v1792_v8  ;;  %v1626_v10 = vpack.c.bf16 %v711_v3, %v710_v2  ;;  %v712_v11 = vld [vmem:[%s2479_s1 + $0x190] sm:$0xff]  ;;  %v713_v12 = vld [vmem:[%s2479_s1 + $0x198] sm:$0xff]  ;;  %v682_v14 = vld [vmem:[%s2479_s1 + $0xa0] sm:$0xff]  ;;  %v145_v3 = vlaneseq }
  0x20   : > { %1567 = vmatpush1.bf16.msra.mxu1 %v1566_v36  ;;  %v683_v15 = vld [vmem:[%s2479_s1 + $0xa8] sm:$0xff]  ;;  %v166_v17 = vld [vmem:[%s1898_s27 + $0x80] sm:$0xff]  ;;  %v1629_v18 = vpack.c.bf16 %v713_v12, %v712_v11  ;;  %v684_v22 = vld [vmem:[%s2479_s1 + $0xb0] sm:$0xff] }
  0x21   : > { %198 = vperm.xlu1 %1726, %v155_v31   ;;  %195 = vperm.xlu0 %1725, %v154_v32   ;;  %v167_v16 = vld [vmem:[%s1898_s27 + $0x88] sm:$0xff]  ;;  %v714_v19 = vld [vmem:[%s2479_s1 + $0x1a0] sm:$0xff]  ;;  %v1584_v21 = vpack.c.bf16 %v683_v15, %v682_v14  ;;  %v685_v23 = vld [vmem:[%s2479_s1 + $0xb8] sm:$0xff] }
  0x22   : > { %1615 = vmatpush1.bf16.msra.mxu0 %v1614_v40  ;;  %1568 = vmatprep.subr.bf16.mxu1 %v1792_v8  ;;  %v715_v20 = vld [vmem:[%s2479_s1 + $0x1a8] sm:$0xff]  ;;  %v169_v24 = vld [vmem:[%s1898_s27 + $0x98] sm:$0xff]  ;;  %v168_v25 = vld [vmem:[%s1898_s27 + $0x90] sm:$0xff]  ;;  %v1587_v29 = vpack.c.bf16 %v685_v23, %v684_v22 }
  0x23   : > { %1616 = vmatprep.subr.bf16.mxu0 %v1792_v8  ;;  %v1632_v26 = vpack.c.bf16 %v715_v20, %v714_v19  ;;  %v716_v27 = vld [vmem:[%s2479_s1 + $0x1b0] sm:$0xff]  ;;  %v717_v28 = vld [vmem:[%s2479_s1 + $0x1b8] sm:$0xff]  ;;  %v686_v30 = vld [vmem:[%s2479_s1 + $0xc0] sm:$0xff] }
  0x24   : > { %1570 = vmatpush1.bf16.msra.mxu1 %v1569_v44  ;;  %v687_v31 = vld [vmem:[%s2479_s1 + $0xc8] sm:$0xff]  ;;  %v170_v33 = vld [vmem:[%s1898_s27 + $0xa0] sm:$0xff]  ;;  %v1635_v34 = vpack.c.bf16 %v717_v28, %v716_v27  ;;  %v173_v40 = vld [vmem:[%s1898_s27 + $0xb8] sm:$0xff] }
  0x25   : > { %204 = vperm.xlu1 %1726, %v157_v38   ;;  %201 = vperm.xlu0 %1725, %v156_v39   ;;  %v171_v32 = vld [vmem:[%s1898_s27 + $0xa8] sm:$0xff]  ;;  %v718_v35 = vld [vmem:[%s2479_s1 + $0x1c0] sm:$0xff]  ;;  %v1590_v37 = vpack.c.bf16 %v687_v31, %v686_v30  ;;  %v688_v38 = vld [vmem:[%s2479_s1 + $0xd0] sm:$0xff] }
  0x26   : > { %1618 = vmatpush1.bf16.msra.mxu0 %v1617_v49  ;;  %1571 = vmatprep.subr.bf16.mxu1 %v1792_v8  ;;  %v719_v36 = vld [vmem:[%s2479_s1 + $0x1c8] sm:$0xff]  ;;  %v689_v39 = vld [vmem:[%s2479_s1 + $0xd8] sm:$0xff]  ;;  %v172_v41 = vld [vmem:[%s1898_s27 + $0xb0] sm:$0xff] }
  0x27   : > { %1619 = vmatprep.subr.bf16.mxu0 %v1792_v8  ;;  %v1638_v42 = vpack.c.bf16 %v719_v36, %v718_v35  ;;  %v720_v43 = vld [vmem:[%s2479_s1 + $0x1d0] sm:$0xff]  ;;  %v721_v44 = vld [vmem:[%s2479_s1 + $0x1d8] sm:$0xff]  ;;  %v1593_v45 = vpack.c.bf16 %v689_v39, %v688_v38  ;;  %v690_v46 = vld [vmem:[%s2479_s1 + $0xe0] sm:$0xff] }
  0x28   : > { %1573 = vmatpush1.bf16.msra.mxu1 %v1572_v52  ;;  %v174_v49 = vld [vmem:[%s1898_s27 + $0xc0] sm:$0xff]  ;;  %v1641_v50 = vpack.c.bf16 %v721_v44, %v720_v43  ;;  %v723_v52 = vld [vmem:[%s2479_s1 + $0x1e8] sm:$0xff]  ;;  %v692_v54 = vld [vmem:[%s2479_s1 + $0xf0] sm:$0xff] }
  0x29   : > { %210 = vperm.xlu1 %1726, %v159_v47   ;;  %207 = vperm.xlu0 %1725, %v158_v48   ;;  %v691_v47 = vld [vmem:[%s2479_s1 + $0xe8] sm:$0xff]  ;;  %v722_v51 = vld [vmem:[%s2479_s1 + $0x1e0] sm:$0xff]  ;;  %v724_v59 = vld [vmem:[%s2479_s1 + $0x1f0] sm:$0xff] }
  0x2a   : > { %1621 = vmatpush1.bf16.msra.mxu0 %v1620_v57  ;;  %1574 = vmatprep.subr.bf16.mxu1 %v1792_v8  ;;  %v175_v48 = vld [vmem:[%s1898_s27 + $0xc8] sm:$0xff]  ;;  %v1596_v53 = vpack.c.bf16 %v691_v47, %v690_v46  ;;  %v176_v57 = vld [vmem:[%s1898_s27 + $0xd0] sm:$0xff]  ;;  %v1644_v58 = vpack.c.bf16 %v723_v52, %v722_v51 }
  0x2b   : > { %1622 = vmatprep.subr.bf16.mxu0 %v1792_v8  ;;  %v179_v62 = vld [vmem:[%s1898_s27 + $0xe8] sm:$0xff]  ;;  %v180_v2 = vld [vmem:[%s1898_s27 + $0xf0] sm:$0xff] }
  0x2c   : > { %1576 = vmatpush1.bf16.msra.mxu1 %v1575_v60  ;;  %v725_v60 = vld [vmem:[%s2479_s1 + $0x1f8] sm:$0xff] }
  0x2d   : > { %216 = vperm.xlu1 %1726, %v161_v55   ;;  %213 = vperm.xlu0 %1725, %v160_v56   ;;  %v693_v55 = vld [vmem:[%s2479_s1 + $0xf8] sm:$0xff] }
  0x2e   : > { %1624 = vmatpush1.bf16.msra.mxu0 %v1623_v1  ;;  %1577 = vmatprep.subr.bf16.mxu1 %v1792_v8  ;;  %v177_v56 = vld [vmem:[%s1898_s27 + $0xd8] sm:$0xff]  ;;  %v1599_v61 = vpack.c.bf16 %v693_v55, %v692_v54 }
  0x2f   : > { %1625 = vmatprep.subr.bf16.mxu0 %v1792_v8  ;;  %v181_v1 = vld [vmem:[%s1898_s27 + $0xf8] sm:$0xff] }
  0x30   : > { %1579 = vmatpush1.bf16.msra.mxu1 %v1578_v4  ;;  %v2122_v4 = vand.u32 127, %v145_v3 }
  0x31   : > { %222 = vperm.xlu1 %1726, %v163_v63   ;;  %219 = vperm.xlu0 %1725, %v162_v0   ;;  %v178_v63 = vld [vmem:[%s1898_s27 + $0xe0] sm:$0xff]  ;;  %v1647_v0 = vpack.c.bf16 %v725_v60, %v724_v59  ;;  %s135_s27 = sand.u32 1, %s1781_s10  }
  0x32   : > { %1627 = vmatpush1.bf16.msra.mxu0 %v1626_v10  ;;  %1580 = vmatprep.subr.bf16.mxu1 %v1792_v8  ;;  %v2125_v5 = vadd.s32 128, %v2122_v4  ;;  %v2128_v6 = vadd.s32 384, %v2122_v4  ;;  %s1288_s28 = sshll.u32 %s135_s27, 8  ;;  %s2437_s13 = scalar_lea.sflag [#allocation3], %s135_s27 }
  0x33   : > { %1628 = vmatprep.subr.bf16.mxu0 %v1792_v8  ;;  %s2392_s29 = scalar_lea.vmem [#allocation2], %s1288_s28 }
  0x34   : > { %1582 = vmatpush1.bf16.msra.mxu1 %v1581_v13  ;;  %s1222_s3 = sshll.u32 %s2392_s29, 4  ;;  %s2432_s3 = int_to_ptr.vmem [resolvable:$true] %s1222_s3 }
  0x35   : > { %228 = vperm.xlu1 %1726, %v165_v7   ;;  %225 = vperm.xlu0 %1725, %v164_v9   ;;  %v2131_v7 = vadd.s32 256, %v2122_v4  ;;  %v1793_v9 = vmov 1.0   ;;  %s1727_s6 = scalar_lea.vmem %s2432_s3, 4096  ;;  %p1734_p0 = scmp.lt.s32.totalorder %s2432_s3, %s1732_s8 }
  0x36   : > { %1630 = vmatpush1.bf16.msra.mxu0 %v1629_v18  ;;  %1583 = vmatprep.subr.bf16.mxu1 %v1792_v8  ;;  %p1728_p11 = scmp.ne.s32.totalorder %s2432_s3, %s1727_s6  ;;  %p1735_p1 = scmp.lt.s32.totalorder %s1733_s14, %s1727_s6 }
  0x37   : > { %1631 = vmatprep.subr.bf16.mxu0 %v1792_v8 }
  0x38   : > { %1585 = vmatpush1.bf16.msra.mxu1 %v1584_v21  ;;  %p1729_p12 = pnand %p1728_p11, %p1850_p5  ;;  %p1736_p2 = por %p1735_p1, %p1734_p0 }
  0x39   : > { %234 = vperm.xlu1 %1726, %v167_v16   ;;  %231 = vperm.xlu0 %1725, %v166_v17  }
  0x3a   : > { %1633 = vmatpush1.bf16.msra.mxu0 %v1632_v26  ;;  %1586 = vmatprep.subr.bf16.mxu1 %v1792_v8  ;;  %p1730_p13 = pneg %p1729_p12 }
  0x3b   : > { %1634 = vmatprep.subr.bf16.mxu0 %v1792_v8 }
  0x3c   : > { %1588 = vmatpush1.bf16.msra.mxu1 %v1587_v29  ;;  %p1737_p3 = pnand %p1736_p2, %p1730_p13 }
  0x3d   : > { %240 = vperm.xlu1 %1726, %v169_v24   ;;  %237 = vperm.xlu0 %1725, %v168_v25  }
  0x3e   : > { %1636 = vmatpush1.bf16.msra.mxu0 %v1635_v34  ;;  %1589 = vmatprep.subr.bf16.mxu1 %v1792_v8 }
  0x3f   : > { %1637 = vmatprep.subr.bf16.mxu0 %v1792_v8 }
  0x40   : > { %1591 = vmatpush1.bf16.msra.mxu1 %v1590_v37 }
  0x41   : > { %246 = vperm.xlu1 %1726, %v171_v32   ;;  %243 = vperm.xlu0 %1725, %v170_v33  }
  0x42   : > { %1639 = vmatpush1.bf16.msra.mxu0 %v1638_v42  ;;  %1592 = vmatprep.subr.bf16.mxu1 %v1792_v8 }
  0x43   : > { %1640 = vmatprep.subr.bf16.mxu0 %v1792_v8 }
  0x44   : > { %1594 = vmatpush1.bf16.msra.mxu1 %v1593_v45 }
  0x45   : > { %252 = vperm.xlu1 %1726, %v173_v40   ;;  %249 = vperm.xlu0 %1725, %v172_v41  }
  0x46   : > { %1642 = vmatpush1.bf16.msra.mxu0 %v1641_v50  ;;  %1595 = vmatprep.subr.bf16.mxu1 %v1792_v8 }
  0x47   : > { %1643 = vmatprep.subr.bf16.mxu0 %v1792_v8 }
  0x48   : > { %1597 = vmatpush1.bf16.msra.mxu1 %v1596_v53 }
  0x49   : > { %258 = vperm.xlu1 %1726, %v175_v48   ;;  %255 = vperm.xlu0 %1725, %v174_v49  }
  0x4a   : > { %1645 = vmatpush1.bf16.msra.mxu0 %v1644_v58  ;;  %1598 = vmatprep.subr.bf16.mxu1 %v1792_v8 }
  0x4b   : > { %1646 = vmatprep.subr.bf16.mxu0 %v1792_v8 }
  0x4c   : > { %1600 = vmatpush1.bf16.msra.mxu1 %v1599_v61 }
  0x4d   : > { %264 = vperm.xlu1 %1726, %v177_v56   ;;  %261 = vperm.xlu0 %1725, %v176_v57  }
  0x4e   : > { %1648 = vmatpush1.bf16.msra.mxu0 %v1647_v0 }
  0x51   : > { %270 = vperm.xlu1 %1726, %v179_v62   ;;  %267 = vperm.xlu0 %1725, %v178_v63  }
  0x55   : > { %276 = vperm.xlu1 %1726, %v181_v1   ;;  %273 = vperm.xlu0 %1725, %v180_v2  }
  0x98   : > { %v184_v8 = vpop.permute.xlu0 %183  ;;  %v190_v10 = vpop.permute.xlu1 %189 }
  0x99   : > { %vm279_vm0 = vcmp.eq.s32.totalorder %v184_v8, %v2125_v5  ;;  %vm281_vm1 = vcmp.eq.s32.totalorder %v184_v8, %v2128_v6  ;;  %vm278_vm2 = vcmp.eq.s32.totalorder %v184_v8, %v2122_v4  ;;  %vm280_vm3 = vcmp.eq.s32.totalorder %v184_v8, %v2131_v7 }
  0x9a   : > { %1419 = vmatprep.mubr.msk.f32.mxu1 %vm279_vm0, %v1793_v9  ;;  %1483 = vmatprep.mubr.msk.f32.mxu0 %vm281_vm1, %v1793_v9  ;;  %vm287_vm4 = vcmp.eq.s32.totalorder %v190_v10, %v2125_v5  ;;  %vm289_vm5 = vcmp.eq.s32.totalorder %v190_v10, %v2128_v6  ;;  %vm286_vm10 = vcmp.eq.s32.totalorder %v190_v10, %v2122_v4 }
  0x9b   : > { %1420 = vmatmul.mubr.msk.f32.vlgmr.msra.gmra.mrb[0].mxu1 %vm278_vm2, %v1793_v9  ;;  %1484 = vmatmul.mubr.msk.f32.vlgmr.msra.gmra.mrb[0].mxu0 %vm280_vm3, %v1793_v9  ;;  %vm288_vm11 = vcmp.eq.s32.totalorder %v190_v10, %v2131_v7 }
  0x9c   : > { %v187_v11 = vpop.permute.xlu0 %186  ;;  %v193_v12 = vpop.permute.xlu1 %192 }
  0x9d   : > { %vm283_vm6 = vcmp.eq.s32.totalorder %v187_v11, %v2125_v5  ;;  %vm285_vm7 = vcmp.eq.s32.totalorder %v187_v11, %v2128_v6  ;;  %vm282_vm8 = vcmp.eq.s32.totalorder %v187_v11, %v2122_v4  ;;  %vm284_vm9 = vcmp.eq.s32.totalorder %v187_v11, %v2131_v7 }
  0x9e   : > { %1421 = vmatprep.mubr.msk.f32.mxu1 %vm283_vm6, %v1793_v9  ;;  %1485 = vmatprep.mubr.msk.f32.mxu0 %vm285_vm7, %v1793_v9  ;;  %vm291_vm12 = vcmp.eq.s32.totalorder %v193_v12, %v2125_v5  ;;  %vm293_vm13 = vcmp.eq.s32.totalorder %v193_v12, %v2128_v6  ;;  %vm290_vm14 = vcmp.eq.s32.totalorder %v193_v12, %v2122_v4 }
  0x9f   : > { %1422 = vmatmul.mubr.msk.f32.gmra.mrb[2].mxu1 %vm282_vm8, %v1793_v9  ;;  %1486 = vmatmul.mubr.msk.f32.gmra.mrb[2].mxu0 %vm284_vm9, %v1793_v9  ;;  %vm292_vm15 = vcmp.eq.s32.totalorder %v193_v12, %v2131_v7 }
  0xa0   : > { %1423 = vmatprep.mubr.msk.f32.mxu1 %vm287_vm4, %v1793_v9  ;;  %1487 = vmatprep.mubr.msk.f32.mxu0 %vm289_vm5, %v1793_v9  ;;  %v196_v13 = vpop.permute.xlu0 %195  ;;  %v199_v14 = vpop.permute.xlu1 %198 }
  0xa1   : > { %vm295_vm0 = vcmp.eq.s32.totalorder %v196_v13, %v2125_v5  ;;  %vm297_vm1 = vcmp.eq.s32.totalorder %v196_v13, %v2128_v6  ;;  %vm294_vm2 = vcmp.eq.s32.totalorder %v196_v13, %v2122_v4  ;;  %vm296_vm3 = vcmp.eq.s32.totalorder %v196_v13, %v2131_v7 }
  0xa2   : > { %vm299_vm4 = vcmp.eq.s32.totalorder %v199_v14, %v2125_v5  ;;  %vm301_vm5 = vcmp.eq.s32.totalorder %v199_v14, %v2128_v6  ;;  %vm298_vm6 = vcmp.eq.s32.totalorder %v199_v14, %v2122_v4  ;;  %vm300_vm7 = vcmp.eq.s32.totalorder %v199_v14, %v2131_v7 }
  0xa3   : > { %1424 = vmatmul.mubr.msk.f32.gmra.mrb[4].mxu1 %vm286_vm10, %v1793_v9  ;;  %1488 = vmatmul.mubr.msk.f32.gmra.mrb[4].mxu0 %vm288_vm11, %v1793_v9 }
  0xa4   : > { %1425 = vmatprep.mubr.msk.f32.mxu1 %vm291_vm12, %v1793_v9  ;;  %1489 = vmatprep.mubr.msk.f32.mxu0 %vm293_vm13, %v1793_v9  ;;  %v202_v15 = vpop.permute.xlu0 %201  ;;  %v205_v16 = vpop.permute.xlu1 %204 }
  0xa5   : > { %vm303_vm8 = vcmp.eq.s32.totalorder %v202_v15, %v2125_v5  ;;  %vm305_vm9 = vcmp.eq.s32.totalorder %v202_v15, %v2128_v6  ;;  %vm302_vm10 = vcmp.eq.s32.totalorder %v202_v15, %v2122_v4  ;;  %vm304_vm11 = vcmp.eq.s32.totalorder %v202_v15, %v2131_v7 }
  0xa6   : > { %vm307_vm12 = vcmp.eq.s32.totalorder %v205_v16, %v2125_v5  ;;  %vm309_vm13 = vcmp.eq.s32.totalorder %v205_v16, %v2128_v6 }
  0xa7   : > { %1426 = vmatmul.mubr.msk.f32.gmra.mrb[6].mxu1 %vm290_vm14, %v1793_v9  ;;  %1490 = vmatmul.mubr.msk.f32.gmra.mrb[6].mxu0 %vm292_vm15, %v1793_v9  ;;  %vm306_vm14 = vcmp.eq.s32.totalorder %v205_v16, %v2122_v4  ;;  %vm308_vm15 = vcmp.eq.s32.totalorder %v205_v16, %v2131_v7 }
  0xa8   : > { %1427 = vmatprep.mubr.msk.f32.mxu1 %vm295_vm0, %v1793_v9  ;;  %1491 = vmatprep.mubr.msk.f32.mxu0 %vm297_vm1, %v1793_v9  ;;  %v208_v17 = vpop.permute.xlu0 %207  ;;  %v211_v18 = vpop.permute.xlu1 %210 }
  0xa9   : > { %vm311_vm0 = vcmp.eq.s32.totalorder %v208_v17, %v2125_v5  ;;  %vm313_vm1 = vcmp.eq.s32.totalorder %v208_v17, %v2128_v6 }
  0xab   : > { %1428 = vmatmul.mubr.msk.f32.gmra.mrb[8].mxu1 %vm294_vm2, %v1793_v9  ;;  %1492 = vmatmul.mubr.msk.f32.gmra.mrb[8].mxu0 %vm296_vm3, %v1793_v9  ;;  %vm310_vm2 = vcmp.eq.s32.totalorder %v208_v17, %v2122_v4  ;;  %vm312_vm3 = vcmp.eq.s32.totalorder %v208_v17, %v2131_v7 }
  0xac   : > { %1429 = vmatprep.mubr.msk.f32.mxu1 %vm299_vm4, %v1793_v9  ;;  %1493 = vmatprep.mubr.msk.f32.mxu0 %vm301_vm5, %v1793_v9  ;;  %vm315_vm4 = vcmp.eq.s32.totalorder %v211_v18, %v2125_v5  ;;  %vm317_vm5 = vcmp.eq.s32.totalorder %v211_v18, %v2128_v6  ;;  %v214_v19 = vpop.permute.xlu0 %213  ;;  %v217_v20 = vpop.permute.xlu1 %216 }
  0xaf   : > { %1430 = vmatmul.mubr.msk.f32.gmra.mrb[10].mxu1 %vm298_vm6, %v1793_v9  ;;  %1494 = vmatmul.mubr.msk.f32.gmra.mrb[10].mxu0 %vm300_vm7, %v1793_v9  ;;  %vm314_vm6 = vcmp.eq.s32.totalorder %v211_v18, %v2122_v4  ;;  %vm316_vm7 = vcmp.eq.s32.totalorder %v211_v18, %v2131_v7 }
  0xb0   : > { %1431 = vmatprep.mubr.msk.f32.mxu1 %vm303_vm8, %v1793_v9  ;;  %1495 = vmatprep.mubr.msk.f32.mxu0 %vm305_vm9, %v1793_v9  ;;  %vm319_vm8 = vcmp.eq.s32.totalorder %v214_v19, %v2125_v5  ;;  %vm321_vm9 = vcmp.eq.s32.totalorder %v214_v19, %v2128_v6  ;;  %v220_v21 = vpop.permute.xlu0 %219  ;;  %v223_v22 = vpop.permute.xlu1 %222 }
  0xb3   : > { %1432 = vmatmul.mubr.msk.f32.gmra.mrb[12].mxu1 %vm302_vm10, %v1793_v9  ;;  %1496 = vmatmul.mubr.msk.f32.gmra.mrb[12].mxu0 %vm304_vm11, %v1793_v9  ;;  %vm318_vm10 = vcmp.eq.s32.totalorder %v214_v19, %v2122_v4  ;;  %vm320_vm11 = vcmp.eq.s32.totalorder %v214_v19, %v2131_v7 }
  0xb4   : > { %1433 = vmatprep.mubr.msk.f32.mxu1 %vm307_vm12, %v1793_v9  ;;  %1497 = vmatprep.mubr.msk.f32.mxu0 %vm309_vm13, %v1793_v9  ;;  %vm323_vm12 = vcmp.eq.s32.totalorder %v217_v20, %v2125_v5  ;;  %vm325_vm13 = vcmp.eq.s32.totalorder %v217_v20, %v2128_v6  ;;  %v226_v23 = vpop.permute.xlu0 %225  ;;  %v229_v24 = vpop.permute.xlu1 %228 }
  0xb7   : > { %1434 = vmatmul.mubr.msk.f32.gmra.mrb[14].mxu1 %vm306_vm14, %v1793_v9  ;;  %1498 = vmatmul.mubr.msk.f32.gmra.mrb[14].mxu0 %vm308_vm15, %v1793_v9  ;;  %vm322_vm14 = vcmp.eq.s32.totalorder %v217_v20, %v2122_v4  ;;  %vm324_vm15 = vcmp.eq.s32.totalorder %v217_v20, %v2131_v7 }
  0xb8   : > { %1435 = vmatprep.mubr.msk.f32.mxu1 %vm311_vm0, %v1793_v9  ;;  %1499 = vmatprep.mubr.msk.f32.mxu0 %vm313_vm1, %v1793_v9  ;;  %vm327_vm0 = vcmp.eq.s32.totalorder %v220_v21, %v2125_v5  ;;  %vm329_vm1 = vcmp.eq.s32.totalorder %v220_v21, %v2128_v6  ;;  %v232_v25 = vpop.permute.xlu0 %231  ;;  %v235_v26 = vpop.permute.xlu1 %234 }
  0xbb   : > { %1436 = vmatmul.mubr.msk.f32.gmra.mrb[16].mxu1 %vm310_vm2, %v1793_v9  ;;  %1500 = vmatmul.mubr.msk.f32.gmra.mrb[16].mxu0 %vm312_vm3, %v1793_v9  ;;  %vm326_vm2 = vcmp.eq.s32.totalorder %v220_v21, %v2122_v4  ;;  %vm328_vm3 = vcmp.eq.s32.totalorder %v220_v21, %v2131_v7 }
  0xbc   : > { %1437 = vmatprep.mubr.msk.f32.mxu1 %vm315_vm4, %v1793_v9  ;;  %1501 = vmatprep.mubr.msk.f32.mxu0 %vm317_vm5, %v1793_v9  ;;  %vm331_vm4 = vcmp.eq.s32.totalorder %v223_v22, %v2125_v5  ;;  %vm333_vm5 = vcmp.eq.s32.totalorder %v223_v22, %v2128_v6  ;;  %v238_v27 = vpop.permute.xlu0 %237  ;;  %v241_v28 = vpop.permute.xlu1 %240 }
  0xbf   : > { %1438 = vmatmul.mubr.msk.f32.gmra.mrb[18].mxu1 %vm314_vm6, %v1793_v9  ;;  %1502 = vmatmul.mubr.msk.f32.gmra.mrb[18].mxu0 %vm316_vm7, %v1793_v9  ;;  %vm330_vm6 = vcmp.eq.s32.totalorder %v223_v22, %v2122_v4  ;;  %vm332_vm7 = vcmp.eq.s32.totalorder %v223_v22, %v2131_v7 }
  0xc0   : > { %1439 = vmatprep.mubr.msk.f32.mxu1 %vm319_vm8, %v1793_v9  ;;  %1503 = vmatprep.mubr.msk.f32.mxu0 %vm321_vm9, %v1793_v9  ;;  %vm335_vm8 = vcmp.eq.s32.totalorder %v226_v23, %v2125_v5  ;;  %vm337_vm9 = vcmp.eq.s32.totalorder %v226_v23, %v2128_v6  ;;  %v244_v29 = vpop.permute.xlu0 %243  ;;  %v247_v30 = vpop.permute.xlu1 %246 }
  0xc3   : > { %1440 = vmatmul.mubr.msk.f32.gmra.mrb[20].mxu1 %vm318_vm10, %v1793_v9  ;;  %1504 = vmatmul.mubr.msk.f32.gmra.mrb[20].mxu0 %vm320_vm11, %v1793_v9  ;;  %vm334_vm10 = vcmp.eq.s32.totalorder %v226_v23, %v2122_v4  ;;  %vm336_vm11 = vcmp.eq.s32.totalorder %v226_v23, %v2131_v7 }
  0xc4   : > { %1441 = vmatprep.mubr.msk.f32.mxu1 %vm323_vm12, %v1793_v9  ;;  %1505 = vmatprep.mubr.msk.f32.mxu0 %vm325_vm13, %v1793_v9  ;;  %vm339_vm12 = vcmp.eq.s32.totalorder %v229_v24, %v2125_v5  ;;  %vm341_vm13 = vcmp.eq.s32.totalorder %v229_v24, %v2128_v6  ;;  %v250_v31 = vpop.permute.xlu0 %249  ;;  %v253_v32 = vpop.permute.xlu1 %252 }
  0xc7   : > { %1442 = vmatmul.mubr.msk.f32.gmra.mrb[22].mxu1 %vm322_vm14, %v1793_v9  ;;  %1506 = vmatmul.mubr.msk.f32.gmra.mrb[22].mxu0 %vm324_vm15, %v1793_v9  ;;  %vm338_vm14 = vcmp.eq.s32.totalorder %v229_v24, %v2122_v4  ;;  %vm340_vm15 = vcmp.eq.s32.totalorder %v229_v24, %v2131_v7 }
  0xc8   : > { %1443 = vmatprep.mubr.msk.f32.mxu1 %vm327_vm0, %v1793_v9  ;;  %1507 = vmatprep.mubr.msk.f32.mxu0 %vm329_vm1, %v1793_v9  ;;  %vm343_vm0 = vcmp.eq.s32.totalorder %v232_v25, %v2125_v5  ;;  %vm345_vm1 = vcmp.eq.s32.totalorder %v232_v25, %v2128_v6  ;;  %v256_v33 = vpop.permute.xlu0 %255  ;;  %v259_v34 = vpop.permute.xlu1 %258 }
  0xcb   : > { %1444 = vmatmul.mubr.msk.f32.gmra.mrb[24].mxu1 %vm326_vm2, %v1793_v9  ;;  %1508 = vmatmul.mubr.msk.f32.gmra.mrb[24].mxu0 %vm328_vm3, %v1793_v9  ;;  %vm342_vm2 = vcmp.eq.s32.totalorder %v232_v25, %v2122_v4  ;;  %vm344_vm3 = vcmp.eq.s32.totalorder %v232_v25, %v2131_v7 }
  0xcc   : > { %1445 = vmatprep.mubr.msk.f32.mxu1 %vm331_vm4, %v1793_v9  ;;  %1509 = vmatprep.mubr.msk.f32.mxu0 %vm333_vm5, %v1793_v9  ;;  %vm347_vm4 = vcmp.eq.s32.totalorder %v235_v26, %v2125_v5  ;;  %vm349_vm5 = vcmp.eq.s32.totalorder %v235_v26, %v2128_v6  ;;  %v262_v35 = vpop.permute.xlu0 %261  ;;  %v265_v36 = vpop.permute.xlu1 %264 }
  0xcf   : > { %1446 = vmatmul.mubr.msk.f32.gmra.mrb[26].mxu1 %vm330_vm6, %v1793_v9  ;;  %1510 = vmatmul.mubr.msk.f32.gmra.mrb[26].mxu0 %vm332_vm7, %v1793_v9  ;;  %vm346_vm6 = vcmp.eq.s32.totalorder %v235_v26, %v2122_v4  ;;  %vm348_vm7 = vcmp.eq.s32.totalorder %v235_v26, %v2131_v7 }
  0xd0   : > { %1447 = vmatprep.mubr.msk.f32.mxu1 %vm335_vm8, %v1793_v9  ;;  %1511 = vmatprep.mubr.msk.f32.mxu0 %vm337_vm9, %v1793_v9  ;;  %vm351_vm8 = vcmp.eq.s32.totalorder %v238_v27, %v2125_v5  ;;  %vm353_vm9 = vcmp.eq.s32.totalorder %v238_v27, %v2128_v6  ;;  %v268_v37 = vpop.permute.xlu0 %267  ;;  %v271_v38 = vpop.permute.xlu1 %270 }
  0xd3   : > { %1448 = vmatmul.mubr.msk.f32.gmra.mrb[28].mxu1 %vm334_vm10, %v1793_v9  ;;  %1512 = vmatmul.mubr.msk.f32.gmra.mrb[28].mxu0 %vm336_vm11, %v1793_v9  ;;  %vm350_vm10 = vcmp.eq.s32.totalorder %v238_v27, %v2122_v4  ;;  %vm352_vm11 = vcmp.eq.s32.totalorder %v238_v27, %v2131_v7 }
  0xd4   : > { %1449 = vmatprep.mubr.msk.f32.mxu1 %vm339_vm12, %v1793_v9  ;;  %1513 = vmatprep.mubr.msk.f32.mxu0 %vm341_vm13, %v1793_v9  ;;  %vm355_vm12 = vcmp.eq.s32.totalorder %v241_v28, %v2125_v5  ;;  %vm357_vm13 = vcmp.eq.s32.totalorder %v241_v28, %v2128_v6  ;;  %v274_v39 = vpop.permute.xlu0 %273  ;;  %v277_v40 = vpop.permute.xlu1 %276 }
  0xd7   : > { %1450 = vmatmul.mubr.msk.f32.gmra.mrb[30].mxu1 %vm338_vm14, %v1793_v9  ;;  %1514 = vmatmul.mubr.msk.f32.gmra.mrb[30].mxu0 %vm340_vm15, %v1793_v9  ;;  %vm354_vm14 = vcmp.eq.s32.totalorder %v241_v28, %v2122_v4  ;;  %vm356_vm15 = vcmp.eq.s32.totalorder %v241_v28, %v2131_v7 }
  0xd8   : > { %1451 = vmatprep.mubr.msk.f32.mxu1 %vm343_vm0, %v1793_v9  ;;  %1515 = vmatprep.mubr.msk.f32.mxu0 %vm345_vm1, %v1793_v9  ;;  %vm359_vm0 = vcmp.eq.s32.totalorder %v244_v29, %v2125_v5  ;;  %vm361_vm1 = vcmp.eq.s32.totalorder %v244_v29, %v2128_v6 }
  0xdb   : > { %1452 = vmatmul.mubr.msk.f32.gmra.mrb[32].mxu1 %vm342_vm2, %v1793_v9  ;;  %1516 = vmatmul.mubr.msk.f32.gmra.mrb[32].mxu0 %vm344_vm3, %v1793_v9  ;;  %vm358_vm2 = vcmp.eq.s32.totalorder %v244_v29, %v2122_v4  ;;  %vm360_vm3 = vcmp.eq.s32.totalorder %v244_v29, %v2131_v7 }
  0xdc   : > { %1453 = vmatprep.mubr.msk.f32.mxu1 %vm347_vm4, %v1793_v9  ;;  %1517 = vmatprep.mubr.msk.f32.mxu0 %vm349_vm5, %v1793_v9  ;;  %vm363_vm4 = vcmp.eq.s32.totalorder %v247_v30, %v2125_v5  ;;  %vm365_vm5 = vcmp.eq.s32.totalorder %v247_v30, %v2128_v6 }
  0xdf   : > { %1454 = vmatmul.mubr.msk.f32.gmra.mrb[34].mxu1 %vm346_vm6, %v1793_v9  ;;  %1518 = vmatmul.mubr.msk.f32.gmra.mrb[34].mxu0 %vm348_vm7, %v1793_v9  ;;  %vm362_vm6 = vcmp.eq.s32.totalorder %v247_v30, %v2122_v4  ;;  %vm364_vm7 = vcmp.eq.s32.totalorder %v247_v30, %v2131_v7 }
  0xe0   : > { %1455 = vmatprep.mubr.msk.f32.mxu1 %vm351_vm8, %v1793_v9  ;;  %1519 = vmatprep.mubr.msk.f32.mxu0 %vm353_vm9, %v1793_v9  ;;  %vm367_vm8 = vcmp.eq.s32.totalorder %v250_v31, %v2125_v5  ;;  %vm369_vm9 = vcmp.eq.s32.totalorder %v250_v31, %v2128_v6 }
  0xe3   : > { %1456 = vmatmul.mubr.msk.f32.gmra.mrb[36].mxu1 %vm350_vm10, %v1793_v9  ;;  %1520 = vmatmul.mubr.msk.f32.gmra.mrb[36].mxu0 %vm352_vm11, %v1793_v9  ;;  %vm366_vm10 = vcmp.eq.s32.totalorder %v250_v31, %v2122_v4  ;;  %vm368_vm11 = vcmp.eq.s32.totalorder %v250_v31, %v2131_v7 }
  0xe4   : > { %1457 = vmatprep.mubr.msk.f32.mxu1 %vm355_vm12, %v1793_v9  ;;  %1521 = vmatprep.mubr.msk.f32.mxu0 %vm357_vm13, %v1793_v9  ;;  %vm371_vm12 = vcmp.eq.s32.totalorder %v253_v32, %v2125_v5  ;;  %vm373_vm13 = vcmp.eq.s32.totalorder %v253_v32, %v2128_v6 }
  0xe7   : > { %1458 = vmatmul.mubr.msk.f32.gmra.mrb[38].mxu1 %vm354_vm14, %v1793_v9  ;;  %1522 = vmatmul.mubr.msk.f32.gmra.mrb[38].mxu0 %vm356_vm15, %v1793_v9  ;;  %vm370_vm14 = vcmp.eq.s32.totalorder %v253_v32, %v2122_v4  ;;  %vm372_vm15 = vcmp.eq.s32.totalorder %v253_v32, %v2131_v7 }
  0xe8   : > { %1459 = vmatprep.mubr.msk.f32.mxu1 %vm359_vm0, %v1793_v9  ;;  %1523 = vmatprep.mubr.msk.f32.mxu0 %vm361_vm1, %v1793_v9  ;;  %vm375_vm0 = vcmp.eq.s32.totalorder %v256_v33, %v2125_v5  ;;  %vm377_vm1 = vcmp.eq.s32.totalorder %v256_v33, %v2128_v6 }
  0xeb   : > { %1460 = vmatmul.mubr.msk.f32.gmra.mrb[40].mxu1 %vm358_vm2, %v1793_v9  ;;  %1524 = vmatmul.mubr.msk.f32.gmra.mrb[40].mxu0 %vm360_vm3, %v1793_v9  ;;  %vm374_vm2 = vcmp.eq.s32.totalorder %v256_v33, %v2122_v4  ;;  %vm376_vm3 = vcmp.eq.s32.totalorder %v256_v33, %v2131_v7 }
  0xec   : > { %1461 = vmatprep.mubr.msk.f32.mxu1 %vm363_vm4, %v1793_v9  ;;  %1525 = vmatprep.mubr.msk.f32.mxu0 %vm365_vm5, %v1793_v9  ;;  %vm379_vm4 = vcmp.eq.s32.totalorder %v259_v34, %v2125_v5  ;;  %vm381_vm5 = vcmp.eq.s32.totalorder %v259_v34, %v2128_v6 }
  0xef   : > { %1462 = vmatmul.mubr.msk.f32.gmra.mrb[42].mxu1 %vm362_vm6, %v1793_v9  ;;  %1526 = vmatmul.mubr.msk.f32.gmra.mrb[42].mxu0 %vm364_vm7, %v1793_v9  ;;  %vm378_vm6 = vcmp.eq.s32.totalorder %v259_v34, %v2122_v4  ;;  %vm380_vm7 = vcmp.eq.s32.totalorder %v259_v34, %v2131_v7 }
  0xf0   : > { %1463 = vmatprep.mubr.msk.f32.mxu1 %vm367_vm8, %v1793_v9  ;;  %1527 = vmatprep.mubr.msk.f32.mxu0 %vm369_vm9, %v1793_v9  ;;  %vm383_vm8 = vcmp.eq.s32.totalorder %v262_v35, %v2125_v5  ;;  %vm385_vm9 = vcmp.eq.s32.totalorder %v262_v35, %v2128_v6 }
  0xf3   : > { %1464 = vmatmul.mubr.msk.f32.gmra.mrb[44].mxu1 %vm366_vm10, %v1793_v9  ;;  %1528 = vmatmul.mubr.msk.f32.gmra.mrb[44].mxu0 %vm368_vm11, %v1793_v9  ;;  %vm382_vm10 = vcmp.eq.s32.totalorder %v262_v35, %v2122_v4  ;;  %vm384_vm11 = vcmp.eq.s32.totalorder %v262_v35, %v2131_v7 }
  0xf4   : > { %1465 = vmatprep.mubr.msk.f32.mxu1 %vm371_vm12, %v1793_v9  ;;  %1529 = vmatprep.mubr.msk.f32.mxu0 %vm373_vm13, %v1793_v9  ;;  %vm387_vm12 = vcmp.eq.s32.totalorder %v265_v36, %v2125_v5  ;;  %vm389_vm13 = vcmp.eq.s32.totalorder %v265_v36, %v2128_v6 }
  0xf7   : > { %1466 = vmatmul.mubr.msk.f32.gmra.mrb[46].mxu1 %vm370_vm14, %v1793_v9  ;;  %1530 = vmatmul.mubr.msk.f32.gmra.mrb[46].mxu0 %vm372_vm15, %v1793_v9  ;;  %vm386_vm14 = vcmp.eq.s32.totalorder %v265_v36, %v2122_v4  ;;  %vm388_vm15 = vcmp.eq.s32.totalorder %v265_v36, %v2131_v7 }
  0xf8   : > { %1467 = vmatprep.mubr.msk.f32.mxu1 %vm375_vm0, %v1793_v9  ;;  %1531 = vmatprep.mubr.msk.f32.mxu0 %vm377_vm1, %v1793_v9  ;;  %vm391_vm0 = vcmp.eq.s32.totalorder %v268_v37, %v2125_v5  ;;  %vm393_vm1 = vcmp.eq.s32.totalorder %v268_v37, %v2128_v6 }
  0xfb   : > { %1468 = vmatmul.mubr.msk.f32.gmra.mrb[48].mxu1 %vm374_vm2, %v1793_v9  ;;  %1532 = vmatmul.mubr.msk.f32.gmra.mrb[48].mxu0 %vm376_vm3, %v1793_v9  ;;  %vm390_vm2 = vcmp.eq.s32.totalorder %v268_v37, %v2122_v4  ;;  %vm392_vm3 = vcmp.eq.s32.totalorder %v268_v37, %v2131_v7 }
  0xfc   : > { %1469 = vmatprep.mubr.msk.f32.mxu1 %vm379_vm4, %v1793_v9  ;;  %1533 = vmatprep.mubr.msk.f32.mxu0 %vm381_vm5, %v1793_v9  ;;  %vm395_vm4 = vcmp.eq.s32.totalorder %v271_v38, %v2125_v5  ;;  %vm397_vm5 = vcmp.eq.s32.totalorder %v271_v38, %v2128_v6 }
  0xff   : > { %1470 = vmatmul.mubr.msk.f32.gmra.mrb[50].mxu1 %vm378_vm6, %v1793_v9  ;;  %1534 = vmatmul.mubr.msk.f32.gmra.mrb[50].mxu0 %vm380_vm7, %v1793_v9  ;;  %vm394_vm6 = vcmp.eq.s32.totalorder %v271_v38, %v2122_v4  ;;  %vm396_vm7 = vcmp.eq.s32.totalorder %v271_v38, %v2131_v7 }
 0x100   : > { %1471 = vmatprep.mubr.msk.f32.mxu1 %vm383_vm8, %v1793_v9  ;;  %1535 = vmatprep.mubr.msk.f32.mxu0 %vm385_vm9, %v1793_v9  ;;  %vm399_vm8 = vcmp.eq.s32.totalorder %v274_v39, %v2125_v5  ;;  %vm401_vm9 = vcmp.eq.s32.totalorder %v274_v39, %v2128_v6 }
 0x103   : > { %1472 = vmatmul.mubr.msk.f32.gmra.mrb[52].mxu1 %vm382_vm10, %v1793_v9  ;;  %1536 = vmatmul.mubr.msk.f32.gmra.mrb[52].mxu0 %vm384_vm11, %v1793_v9  ;;  %vm398_vm10 = vcmp.eq.s32.totalorder %v274_v39, %v2122_v4  ;;  %vm400_vm11 = vcmp.eq.s32.totalorder %v274_v39, %v2131_v7 }
 0x104   : > { %1473 = vmatprep.mubr.msk.f32.mxu1 %vm387_vm12, %v1793_v9  ;;  %1537 = vmatprep.mubr.msk.f32.mxu0 %vm389_vm13, %v1793_v9  ;;  %vm403_vm12 = vcmp.eq.s32.totalorder %v277_v40, %v2125_v5  ;;  %vm405_vm13 = vcmp.eq.s32.totalorder %v277_v40, %v2128_v6 }
 0x107   : > { %1474 = vmatmul.mubr.msk.f32.gmra.mrb[54].mxu1 %vm386_vm14, %v1793_v9  ;;  %1538 = vmatmul.mubr.msk.f32.gmra.mrb[54].mxu0 %vm388_vm15, %v1793_v9  ;;  %vm402_vm14 = vcmp.eq.s32.totalorder %v277_v40, %v2122_v4  ;;  %vm404_vm15 = vcmp.eq.s32.totalorder %v277_v40, %v2131_v7 }
 0x108   : > { %1475 = vmatprep.mubr.msk.f32.mxu1 %vm391_vm0, %v1793_v9  ;;  %1539 = vmatprep.mubr.msk.f32.mxu0 %vm393_vm1, %v1793_v9 }
 0x10b   : > { %1476 = vmatmul.mubr.msk.f32.gmra.mrb[56].mxu1 %vm390_vm2, %v1793_v9  ;;  %1540 = vmatmul.mubr.msk.f32.gmra.mrb[56].mxu0 %vm392_vm3, %v1793_v9 }
 0x10c   : > { %1477 = vmatprep.mubr.msk.f32.mxu1 %vm395_vm4, %v1793_v9  ;;  %1541 = vmatprep.mubr.msk.f32.mxu0 %vm397_vm5, %v1793_v9 }
 0x10f   : > { %1478 = vmatmul.mubr.msk.f32.gmra.mrb[58].mxu1 %vm394_vm6, %v1793_v9  ;;  %1542 = vmatmul.mubr.msk.f32.gmra.mrb[58].mxu0 %vm396_vm7, %v1793_v9 }
 0x110   : > { %1479 = vmatprep.mubr.msk.f32.mxu1 %vm399_vm8, %v1793_v9  ;;  %1543 = vmatprep.mubr.msk.f32.mxu0 %vm401_vm9, %v1793_v9 }
 0x113   : > { %1480 = vmatmul.mubr.msk.f32.gmra.mrb[60].mxu1 %vm398_vm10, %v1793_v9  ;;  %1544 = vmatmul.mubr.msk.f32.gmra.mrb[60].mxu0 %vm400_vm11, %v1793_v9 }
 0x114   : > { %1481 = vmatprep.mubr.msk.f32.mxu1 %vm403_vm12, %v1793_v9  ;;  %1545 = vmatprep.mubr.msk.f32.mxu0 %vm405_vm13, %v1793_v9 }
 0x117   : > { %1482 = vmatmul.mubr.msk.f32.gmra.mrb[62].mxu1 %vm402_vm14, %v1793_v9  ;;  %1546 = vmatmul.mubr.msk.f32.gmra.mrb[62].mxu0 %vm404_vm15, %v1793_v9 }
 0x16e   : > { %v792_v41 = vpop.f32.mrb[0].mxu1  ;;  %v1017_v42 = vpop.f32.mrb[0].mxu0 }
 0x16f   : > { %v1018_v43 = vadd.f32 %v1017_v42, %v792_v41  ;;  %v794_v44 = vpop.f32.mrb[1].mxu1  ;;  %v1019_v45 = vpop.f32.mrb[1].mxu0 }
 0x171   : > { %1176 = vst [vmem:[%s2392_s29] sm:$0xff] %v1018_v43 }
 0x172   : > { %v797_v46 = vpop.f32.mrb[2].mxu1  ;;  %v1022_v47 = vpop.f32.mrb[2].mxu0 }
 0x173   : > { %v1023_v48 = vadd.f32 %v1022_v47, %v797_v46  ;;  %v799_v49 = vpop.f32.mrb[3].mxu1  ;;  %v1024_v50 = vpop.f32.mrb[3].mxu0 }
 0x175   : > { %1177 = vst [vmem:[%s2392_s29 + $0x8] sm:$0xff] %v1023_v48 }
 0x176   : > { %v802_v51 = vpop.f32.mrb[4].mxu1  ;;  %v1027_v52 = vpop.f32.mrb[4].mxu0 }
 0x177   : > { %v1028_v53 = vadd.f32 %v1027_v52, %v802_v51  ;;  %v804_v54 = vpop.f32.mrb[5].mxu1  ;;  %v1029_v55 = vpop.f32.mrb[5].mxu0 }
 0x179   : > { %1178 = vst [vmem:[%s2392_s29 + $0x10] sm:$0xff] %v1028_v53 }
 0x17a   : > { %v807_v56 = vpop.f32.mrb[6].mxu1  ;;  %v1032_v57 = vpop.f32.mrb[6].mxu0 }
 0x17b   : > { %v1033_v58 = vadd.f32 %v1032_v57, %v807_v56  ;;  %v809_v59 = vpop.f32.mrb[7].mxu1  ;;  %v1034_v60 = vpop.f32.mrb[7].mxu0 }
 0x17d   : > { %1179 = vst [vmem:[%s2392_s29 + $0x18] sm:$0xff] %v1033_v58 }
 0x17e   : > { %v812_v61 = vpop.f32.mrb[8].mxu1  ;;  %v1037_v62 = vpop.f32.mrb[8].mxu0 }
 0x17f   : > { %v1038_v63 = vadd.f32 %v1037_v62, %v812_v61  ;;  %v814_v0 = vpop.f32.mrb[9].mxu1  ;;  %v1039_v1 = vpop.f32.mrb[9].mxu0 }
 0x181   : > { %1180 = vst [vmem:[%s2392_s29 + $0x20] sm:$0xff] %v1038_v63 }
 0x182   : > { %v817_v2 = vpop.f32.mrb[10].mxu1  ;;  %v1042_v3 = vpop.f32.mrb[10].mxu0 }
 0x183   : > { %v1043_v4 = vadd.f32 %v1042_v3, %v817_v2  ;;  %v819_v5 = vpop.f32.mrb[11].mxu1  ;;  %v1044_v6 = vpop.f32.mrb[11].mxu0 }
 0x185   : > { %1181 = vst [vmem:[%s2392_s29 + $0x28] sm:$0xff] %v1043_v4 }
 0x186   : > { %v822_v7 = vpop.f32.mrb[12].mxu1  ;;  %v1047_v8 = vpop.f32.mrb[12].mxu0 }
 0x187   : > { %v1048_v9 = vadd.f32 %v1047_v8, %v822_v7  ;;  %v824_v10 = vpop.f32.mrb[13].mxu1  ;;  %v1049_v11 = vpop.f32.mrb[13].mxu0 }
 0x189   : > { %1182 = vst [vmem:[%s2392_s29 + $0x30] sm:$0xff] %v1048_v9 }
 0x18a   : > { %v827_v12 = vpop.f32.mrb[14].mxu1  ;;  %v1052_v13 = vpop.f32.mrb[14].mxu0 }
 0x18b   : > { %v1053_v14 = vadd.f32 %v1052_v13, %v827_v12  ;;  %v829_v15 = vpop.f32.mrb[15].mxu1  ;;  %v1054_v16 = vpop.f32.mrb[15].mxu0 }
 0x18d   : > { %1183 = vst [vmem:[%s2392_s29 + $0x38] sm:$0xff] %v1053_v14 }
 0x18e   : > { %v832_v17 = vpop.f32.mrb[16].mxu1  ;;  %v1057_v18 = vpop.f32.mrb[16].mxu0 }
 0x18f   : > { %v1058_v19 = vadd.f32 %v1057_v18, %v832_v17  ;;  %v834_v20 = vpop.f32.mrb[17].mxu1  ;;  %v1059_v21 = vpop.f32.mrb[17].mxu0 }
 0x191   : > { %1184 = vst [vmem:[%s2392_s29 + $0x40] sm:$0xff] %v1058_v19 }
 0x192   : > { %v837_v22 = vpop.f32.mrb[18].mxu1  ;;  %v1062_v23 = vpop.f32.mrb[18].mxu0 }
 0x193   : > { %v1063_v24 = vadd.f32 %v1062_v23, %v837_v22  ;;  %v839_v25 = vpop.f32.mrb[19].mxu1  ;;  %v1064_v26 = vpop.f32.mrb[19].mxu0 }
 0x195   : > { %1185 = vst [vmem:[%s2392_s29 + $0x48] sm:$0xff] %v1063_v24 }
 0x196   : > { %v842_v27 = vpop.f32.mrb[20].mxu1  ;;  %v1067_v28 = vpop.f32.mrb[20].mxu0 }
 0x197   : > { %v1068_v29 = vadd.f32 %v1067_v28, %v842_v27  ;;  %v844_v30 = vpop.f32.mrb[21].mxu1  ;;  %v1069_v31 = vpop.f32.mrb[21].mxu0 }
 0x199   : > { %1186 = vst [vmem:[%s2392_s29 + $0x50] sm:$0xff] %v1068_v29 }
 0x19a   : > { %v847_v32 = vpop.f32.mrb[22].mxu1  ;;  %v1072_v33 = vpop.f32.mrb[22].mxu0 }
 0x19b   : > { %v1073_v34 = vadd.f32 %v1072_v33, %v847_v32  ;;  %v849_v35 = vpop.f32.mrb[23].mxu1  ;;  %v1074_v36 = vpop.f32.mrb[23].mxu0 }
 0x19d   : > { %1187 = vst [vmem:[%s2392_s29 + $0x58] sm:$0xff] %v1073_v34 }
 0x19e   : > { %v852_v37 = vpop.f32.mrb[24].mxu1  ;;  %v1077_v38 = vpop.f32.mrb[24].mxu0 }
 0x19f   : > { %v1078_v39 = vadd.f32 %v1077_v38, %v852_v37  ;;  %v854_v40 = vpop.f32.mrb[25].mxu1  ;;  %v1079_v41 = vpop.f32.mrb[25].mxu0 }
 0x1a1   : > { %1188 = vst [vmem:[%s2392_s29 + $0x60] sm:$0xff] %v1078_v39 }
 0x1a2   : > { %v857_v42 = vpop.f32.mrb[26].mxu1  ;;  %v1082_v43 = vpop.f32.mrb[26].mxu0 }
 0x1a3   : > { %v1083_v44 = vadd.f32 %v1082_v43, %v857_v42  ;;  %v859_v45 = vpop.f32.mrb[27].mxu1  ;;  %v1084_v46 = vpop.f32.mrb[27].mxu0 }
 0x1a5   : > { %1189 = vst [vmem:[%s2392_s29 + $0x68] sm:$0xff] %v1083_v44 }
 0x1a6   : > { %v862_v47 = vpop.f32.mrb[28].mxu1  ;;  %v1087_v48 = vpop.f32.mrb[28].mxu0 }
 0x1a7   : > { %v1088_v49 = vadd.f32 %v1087_v48, %v862_v47  ;;  %v864_v50 = vpop.f32.mrb[29].mxu1  ;;  %v1089_v51 = vpop.f32.mrb[29].mxu0 }
 0x1a9   : > { %1190 = vst [vmem:[%s2392_s29 + $0x70] sm:$0xff] %v1088_v49 }
 0x1aa   : > { %v867_v52 = vpop.f32.mrb[30].mxu1  ;;  %v1092_v53 = vpop.f32.mrb[30].mxu0 }
 0x1ab   : > { %v1093_v54 = vadd.f32 %v1092_v53, %v867_v52  ;;  %v869_v55 = vpop.f32.mrb[31].mxu1  ;;  %v1094_v56 = vpop.f32.mrb[31].mxu0 }
 0x1ad   : > { %1191 = vst [vmem:[%s2392_s29 + $0x78] sm:$0xff] %v1093_v54 }
 0x1ae   : > { %v872_v57 = vpop.f32.mrb[32].mxu1  ;;  %v1097_v58 = vpop.f32.mrb[32].mxu0 }
 0x1af   : > { %v1098_v59 = vadd.f32 %v1097_v58, %v872_v57  ;;  %v874_v60 = vpop.f32.mrb[33].mxu1  ;;  %v1099_v61 = vpop.f32.mrb[33].mxu0 }
 0x1b1   : > { %1192 = vst [vmem:[%s2392_s29 + $0x80] sm:$0xff] %v1098_v59 }
 0x1b2   : > { %v877_v62 = vpop.f32.mrb[34].mxu1  ;;  %v1102_v63 = vpop.f32.mrb[34].mxu0 }
 0x1b3   : > { %v1103_v0 = vadd.f32 %v1102_v63, %v877_v62  ;;  %v879_v1 = vpop.f32.mrb[35].mxu1  ;;  %v1104_v2 = vpop.f32.mrb[35].mxu0 }
 0x1b5   : > { %1193 = vst [vmem:[%s2392_s29 + $0x88] sm:$0xff] %v1103_v0 }
 0x1b6   : > { %v882_v3 = vpop.f32.mrb[36].mxu1  ;;  %v1107_v4 = vpop.f32.mrb[36].mxu0 }
 0x1b7   : > { %v1108_v5 = vadd.f32 %v1107_v4, %v882_v3  ;;  %v884_v6 = vpop.f32.mrb[37].mxu1  ;;  %v1109_v7 = vpop.f32.mrb[37].mxu0 }
 0x1b9   : > { %1194 = vst [vmem:[%s2392_s29 + $0x90] sm:$0xff] %v1108_v5 }
 0x1ba   : > { %v887_v8 = vpop.f32.mrb[38].mxu1  ;;  %v1112_v9 = vpop.f32.mrb[38].mxu0 }
 0x1bb   : > { %v1113_v10 = vadd.f32 %v1112_v9, %v887_v8  ;;  %v889_v11 = vpop.f32.mrb[39].mxu1  ;;  %v1114_v12 = vpop.f32.mrb[39].mxu0 }
 0x1bd   : > { %1195 = vst [vmem:[%s2392_s29 + $0x98] sm:$0xff] %v1113_v10 }
 0x1be   : > { %v892_v13 = vpop.f32.mrb[40].mxu1  ;;  %v1117_v14 = vpop.f32.mrb[40].mxu0 }
 0x1bf   : > { %v1118_v15 = vadd.f32 %v1117_v14, %v892_v13  ;;  %v894_v16 = vpop.f32.mrb[41].mxu1  ;;  %v1119_v17 = vpop.f32.mrb[41].mxu0 }
 0x1c1   : > { %1196 = vst [vmem:[%s2392_s29 + $0xa0] sm:$0xff] %v1118_v15 }
 0x1c2   : > { %v897_v18 = vpop.f32.mrb[42].mxu1  ;;  %v1122_v19 = vpop.f32.mrb[42].mxu0 }
 0x1c3   : > { %v1123_v20 = vadd.f32 %v1122_v19, %v897_v18  ;;  %v899_v21 = vpop.f32.mrb[43].mxu1  ;;  %v1124_v22 = vpop.f32.mrb[43].mxu0 }
 0x1c5   : > { %1197 = vst [vmem:[%s2392_s29 + $0xa8] sm:$0xff] %v1123_v20 }
 0x1c6   : > { %v902_v23 = vpop.f32.mrb[44].mxu1  ;;  %v1127_v24 = vpop.f32.mrb[44].mxu0 }
 0x1c7   : > { %v1128_v25 = vadd.f32 %v1127_v24, %v902_v23  ;;  %v904_v26 = vpop.f32.mrb[45].mxu1  ;;  %v1129_v27 = vpop.f32.mrb[45].mxu0 }
 0x1c9   : > { %1198 = vst [vmem:[%s2392_s29 + $0xb0] sm:$0xff] %v1128_v25 }
 0x1ca   : > { %v907_v28 = vpop.f32.mrb[46].mxu1  ;;  %v1132_v29 = vpop.f32.mrb[46].mxu0 }
 0x1cb   : > { %v1133_v30 = vadd.f32 %v1132_v29, %v907_v28  ;;  %v909_v31 = vpop.f32.mrb[47].mxu1  ;;  %v1134_v32 = vpop.f32.mrb[47].mxu0 }
 0x1cd   : > { %1199 = vst [vmem:[%s2392_s29 + $0xb8] sm:$0xff] %v1133_v30 }
 0x1ce   : > { %v912_v33 = vpop.f32.mrb[48].mxu1  ;;  %v1137_v34 = vpop.f32.mrb[48].mxu0 }
 0x1cf   : > { %v1138_v35 = vadd.f32 %v1137_v34, %v912_v33  ;;  %v914_v36 = vpop.f32.mrb[49].mxu1  ;;  %v1139_v37 = vpop.f32.mrb[49].mxu0 }
 0x1d1   : > { %1200 = vst [vmem:[%s2392_s29 + $0xc0] sm:$0xff] %v1138_v35 }
 0x1d2   : > { %v917_v38 = vpop.f32.mrb[50].mxu1  ;;  %v1142_v39 = vpop.f32.mrb[50].mxu0 }
 0x1d3   : > { %v1143_v40 = vadd.f32 %v1142_v39, %v917_v38  ;;  %v919_v41 = vpop.f32.mrb[51].mxu1  ;;  %v1144_v42 = vpop.f32.mrb[51].mxu0 }
 0x1d5   : > { %1201 = vst [vmem:[%s2392_s29 + $0xc8] sm:$0xff] %v1143_v40 }
 0x1d6   : > { %v922_v43 = vpop.f32.mrb[52].mxu1  ;;  %v1147_v44 = vpop.f32.mrb[52].mxu0 }
 0x1d7   : > { %v1148_v45 = vadd.f32 %v1147_v44, %v922_v43  ;;  %v924_v46 = vpop.f32.mrb[53].mxu1  ;;  %v1149_v47 = vpop.f32.mrb[53].mxu0 }
 0x1d9   : > { %1202 = vst [vmem:[%s2392_s29 + $0xd0] sm:$0xff] %v1148_v45 }
 0x1da   : > { %v927_v48 = vpop.f32.mrb[54].mxu1  ;;  %v1152_v49 = vpop.f32.mrb[54].mxu0 }
 0x1db   : > { %v1153_v50 = vadd.f32 %v1152_v49, %v927_v48  ;;  %v929_v51 = vpop.f32.mrb[55].mxu1  ;;  %v1154_v52 = vpop.f32.mrb[55].mxu0 }
 0x1dd   : > { %1203 = vst [vmem:[%s2392_s29 + $0xd8] sm:$0xff] %v1153_v50 }
 0x1de   : > { %v932_v53 = vpop.f32.mrb[56].mxu1  ;;  %v1157_v54 = vpop.f32.mrb[56].mxu0 }
 0x1df   : > { %v1158_v55 = vadd.f32 %v1157_v54, %v932_v53  ;;  %v934_v56 = vpop.f32.mrb[57].mxu1  ;;  %v1159_v57 = vpop.f32.mrb[57].mxu0 }
 0x1e1   : > { %1204 = vst [vmem:[%s2392_s29 + $0xe0] sm:$0xff] %v1158_v55 }
 0x1e2   : > { %v937_v58 = vpop.f32.mrb[58].mxu1  ;;  %v1162_v59 = vpop.f32.mrb[58].mxu0 }
 0x1e3   : > { %v1163_v60 = vadd.f32 %v1162_v59, %v937_v58  ;;  %v939_v61 = vpop.f32.mrb[59].mxu1  ;;  %v1164_v62 = vpop.f32.mrb[59].mxu0 }
 0x1e5   : > { %1205 = vst [vmem:[%s2392_s29 + $0xe8] sm:$0xff] %v1163_v60 }
 0x1e6   : > { %v942_v63 = vpop.f32.mrb[60].mxu1  ;;  %v1167_v0 = vpop.f32.mrb[60].mxu0 }
 0x1e7   : > { %v1168_v1 = vadd.f32 %v1167_v0, %v942_v63  ;;  %v944_v2 = vpop.f32.mrb[61].mxu1  ;;  %v1169_v3 = vpop.f32.mrb[61].mxu0 }
 0x1e9   : > { %1206 = vst [vmem:[%s2392_s29 + $0xf0] sm:$0xff] %v1168_v1 }
 0x1ea   : > { %v947_v4 = vpop.f32.mrb[62].mxu1  ;;  %v1172_v5 = vpop.f32.mrb[62].mxu0 }
 0x1eb   : > { %v1173_v6 = vadd.f32 %v1172_v5, %v947_v4  ;;  %v949_v7 = vpop.f32.mrb[63].mxu1  ;;  %v1174_v8 = vpop.f32.mrb[63].mxu0 }
 0x1ed   : > { %1207 = vst [vmem:[%s2392_s29 + $0xf8] sm:$0xff] %v1173_v6 }
 0x1ee   : > { %1740 = shalt.err (!%p1737_p3)
}
 0x1ef   : > { %s1741_s16 = scalar_lea.hbm %s2430_s5, 4096  ;;  %s1745_s23 = scalar_lea.hbm %s2480_s2, 8192 }
 0x1f0   : > { %p1742_p4 = scmp.ne.s32.totalorder %s2430_s5, %s1741_s16  ;;  %p1746_p9 = scmp.lt.u32.totalorder %s2430_s5, %s2480_s2 }
 0x1f1   : > { %p1747_p10 = scmp.lt.u32.totalorder %s1745_s23, %s1741_s16  ;;  %p1749_p12 = scmp.lt.u32.totalorder %s1741_s16, %s2430_s5 }
 0x1f2   : > { %p1743_p7 = pnand %p1742_p4, %p1850_p5 }
 0x1f3   : > { %p1748_p11 = por %p1747_p10, %p1746_p9 }
 0x1f4   : > { %p1744_p8 = pneg %p1743_p7 }
 0x1f5   : > { %p1750_p13 = por %p1749_p12, %p1748_p11 }
 0x1f7   : > { %p1751_p0 = pnand %p1750_p13, %p1744_p8 }
 0x1f9   : > { %1754 = shalt.err (!%p1751_p0)
}
 0x1fa   : > { %s1795_s26 = smov 128   ;;  %s1796_s27 = smov 8  }
 0x1fb   : > { %1681 = dma.vmem_to_hbm [thread:$0]  (%p1850_p5), %s2432_s3, 4096, %s2430_s5, %s2437_s13, %s1795_s26, %s1795_s26, %s1796_s27  }
 0x1fc PF: > { %p1687_p1 = scmp.ge.s32.totalorder %s1789_s12, 2  ;;  %s1237_s28 = sand.u32 1, %s1777_s9  }
 0x1fd   : > { %s1238_s29 = scalar_lea.sflag [#allocation3], %s1237_s28 }
 0x1fe   : > { %p1684_p2 = pnand %p1687_p1, %p1854_p6 }
 0x200   : > { %1772 = dma.done.wait (!%p1684_p2), %s1238_s29, 4096  }
 0x201   : > { %1774 = vsyncadd (!%p1684_p2), %s1238_s29, 4294963200  ;;  %p12_p3 = scmp.ge.s32.totalorder %s1837_s15, 4   ;;  %s2483_s9 = smov %s1781_s10 }
 0x202   : > { %s2484_s10 = smov %s1785_s11  ;;  %s2485_s11 = smov %s1848_s18 }
 0x203   : > { %s2486_s12 = smov %s1837_s15  ;;  %14 = sbr.rel (!%p12_p3) target bundleno = 3 (0x3), region = 63 }
 0x20a   :  { %1243 = vsyncpa [#allocation3], 1 }
 0x20b   :  { %1245 = vsyncpa [#allocation3 + $0x1], 1 }

</bundles_post_ra>
